<compile_context>
chip_gen: v5e
topology: v5e:2x2
jax: 0.10.0
libtpu: 0.0.40
codegen_flags: <defaults>
</compile_context>

<pallas_src>
import jax
import jax.numpy as jnp
from jax.experimental import pallas as pl
from jax.experimental.pallas import tpu as pltpu


# --------------------------------- kernel ------------------------------------
def temporal_embedding_kernel(x_ref, emb_ref, out_ref):
    # x_ref:   (tile_rows, P*D)  one tile of flattened (batch*num_nodes) rows
    # emb_ref: (1,         P*D)  flattened patch embedding (VMEM-resident)
    # Broadcast add over the sublane (row) axis; pure VPU work.
    out_ref[...] = x_ref[...] + emb_ref[...]


# -------------------------------- wrapper ------------------------------------
def temporal_embedding(x, patch_embedding, *, max_block_bytes=4 << 20):
    """out = x + patch_embedding broadcast over (batch, num_nodes); dropout = identity."""
    B, N, P, D = x.shape
    assert patch_embedding.shape == (P, D)
    rows = B * N
    M = P * D

    # Row-major reshapes: no data movement, just a lane-dense 2-D view.
    xr = x.reshape(rows, M)
    emb = patch_embedding.reshape(1, M)

    # Row tile: whole array if it fits the per-block budget, otherwise the
    # largest sublane-aligned (multiple-of-8) row count under the budget.
    bytes_per_row = max(1, M * x.dtype.itemsize)
    budget_rows = max(1, max_block_bytes // bytes_per_row)
    if rows <= budget_rows:
        tile_rows = rows                          # full extent -> always legal
    else:
        tile_rows = max(8, (budget_rows // 8) * 8)  # (8,128)-aligned blocks
    grid = (pl.cdiv(rows, tile_rows),)

    out = pl.pallas_call(
        temporal_embedding_kernel,
        out_shape=jax.ShapeDtypeStruct((rows, M), x.dtype),
        grid=grid,
        in_specs=[
            pl.BlockSpec((tile_rows, M), lambda i: (i, 0)),  # streamed x rows
            pl.BlockSpec((1, M), lambda i: (0, 0)),          # resident embedding
        ],
        out_specs=pl.BlockSpec((tile_rows, M), lambda i: (i, 0)),
        compiler_params=pltpu.CompilerParams(
            dimension_semantics=("parallel",),
        ),
    )(xr, emb)

    return out.reshape(B, N, P, D)


# ----------------------------- pure-JAX reference -----------------------------
def ref_forward(x, patch_embedding):
    return x + patch_embedding[None, None, :, :]


# ------------------------------------ main ------------------------------------
if __name__ == "__main__":
    key = jax.random.PRNGKey(0)
    kx, ke = jax.random.split(key)

    # Small shapes consistent with the module.
    batch, num_nodes, patch_num, d_model = 2, 4, 8, 32

    x = jax.random.normal(kx, (batch, num_nodes, patch_num, d_model), dtype=jnp.float32)
    # nn.init.uniform_(-0.02, 0.02) on (patch_num, d_model)
    patch_embedding = jax.random.uniform(
        ke, (patch_num, d_model), dtype=jnp.float32, minval=-0.02, maxval=0.02
    )

    out = temporal_embedding(x, patch_embedding)
    jax.block_until_ready(out)

    ref = ref_forward(x, patch_embedding)
    assert out.shape == (batch, num_nodes, patch_num, d_model)
    assert jnp.allclose(out, ref, atol=1e-6, rtol=1e-6)
    print("KERNEL_OK")
</pallas_src>

<mosaic_0001>
module attributes {stable_mosaic.version = 11 : i64} {
  func.func @temporal_embedding_kernel(%arg0: i32, %arg1: memref<8x256xf32, #tpu.memory_space<vmem>>, %arg2: memref<1x256xf32, #tpu.memory_space<vmem>>, %arg3: memref<8x256xf32, #tpu.memory_space<vmem>>) attributes {dimension_semantics = [#tpu.dimension_semantics<parallel>], iteration_bounds = array<i64: 1>, scalar_prefetch = 0 : i64, scratch_operands = 0 : i64, tpu.core_type = #tpu.core_type<tc>, window_params = [{transform_indices = @transform_0, window_bounds = array<i64: 8, 256>}, {pipeline_mode = #tpu.pipeline_mode<synchronous>, transform_indices = @transform_1, window_bounds = array<i64: 1, 256>}, {transform_indices = @transform_2, window_bounds = array<i64: 8, 256>}]} {
    %c0 = arith.constant 0 : index
    %c0_0 = arith.constant 0 : index
    %0 = vector.load %arg1[%c0, %c0_0] : memref<8x256xf32, #tpu.memory_space<vmem>>, vector<8x256xf32>
    %c0_1 = arith.constant 0 : index
    %c0_2 = arith.constant 0 : index
    %1 = vector.load %arg2[%c0_1, %c0_2] : memref<1x256xf32, #tpu.memory_space<vmem>>, vector<1x256xf32>
    %2 = vector.broadcast %1 : vector<1x256xf32> to vector<8x256xf32>
    %3 = arith.addf %0, %2 : vector<8x256xf32>
    %c0_3 = arith.constant 0 : index
    %c0_4 = arith.constant 0 : index
    %4 = vector.load %arg3[%c0_3, %c0_4] : memref<8x256xf32, #tpu.memory_space<vmem>>, vector<8x256xf32>
    tpu.vector_store %arg3[%c0_3, %c0_4], %3 {strides = array<i32>} : memref<8x256xf32, #tpu.memory_space<vmem>>, vector<8x256xf32>,
    return
  }
  func.func @transform_0(%arg0: i32) -> (i32, i32) {
    %c0_i32 = arith.constant 0 : i32
    %c0_i32_0 = arith.constant 0 : i32
    return %arg0, %c0_i32 : i32, i32
  }
  func.func @transform_1(%arg0: i32) -> (i32, i32) {
    %c0_i32 = arith.constant 0 : i32
    %c0_i32_0 = arith.constant 0 : i32
    %c0_i32_1 = arith.constant 0 : i32
    return %c0_i32, %c0_i32_0 : i32, i32
  }
  func.func @transform_2(%arg0: i32) -> (i32, i32) {
    %c0_i32 = arith.constant 0 : i32
    %c0_i32_0 = arith.constant 0 : i32
    return %arg0, %c0_i32 : i32, i32
  }
}

</mosaic_0001>

<bundles_post_ra>
// kernel: tpu_custom_call.1
= control target key start
LH: loop header
LB: loop body
LE: loop exit
PB: predicated region body
PF: predicated region fallthrough
CT: control target
= control target key end

     0   :  { %7 = vsyncpa [#allocation3], 0  ;;  %s178_s0 = inlined_call_operand.hbm [shape: f32[8,256], index: 0, kind: input, shape index: {}]   ;;  %s179_s1 = inlined_call_operand.hbm [shape: f32[1,256], index: 1, kind: input, shape index: {}]   ;;  %s180_s2 = inlined_call_operand.hbm [shape: f32[8,256], index: 2, kind: output, shape index: {}]  }
   0x1   :  { %8 = vsyncpa [#allocation6], 0 }
   0x2   :  { %9 = vsyncpa [#allocation4], 0  ;;  %s15_s11 = sshll.u32 %s178_s0, 4  ;;  %s151_s12 = smov [#allocation2]   ;;  %s16_s11 = int_to_ptr.hbm [resolvable:$true] %s15_s11 }
   0x3   :  { %s17_s13 = sshll.u32 %s151_s12, 4  ;;  %s26_s16 = sshll.u32 %s179_s1, 4  ;;  %s18_s13 = int_to_ptr.vmem [resolvable:$true] %s17_s13  ;;  %s27_s16 = int_to_ptr.hbm [resolvable:$true] %s26_s16 }
   0x4   :  { %20 = dma.hbm_to_vmem [thread:$0]  %s16_s11, 256, %s18_s13, [#allocation3]  }
   0x5   :  { %s152_s17 = smov [#allocation5]  }
   0x6   :  { %s28_s18 = sshll.u32 %s152_s17, 4  ;;  %s29_s18 = int_to_ptr.vmem [resolvable:$true] %s28_s18 }
   0x7   :  { %31 = dma.hbm_to_vmem [thread:$0]  %s27_s16, 32, %s29_s18, [#allocation6]  }
   0x8   :  { %145 = dma.done.wait [#allocation3], 256  }
   0x9   :  { %146 = vsyncadd [#allocation3], 4294967040 }
   0xa   :  { %147 = dma.done.wait [#allocation6], 32  }
   0xb   :  { %148 = vsyncadd [#allocation6], 4294967264  ;;  %v40_v0 = vld [vmem:[#allocation2] sm:$0xff]  ;;  %v42_v1 = vld [vmem:[#allocation5] sm:$0x3]  ;;  %s153_s0 = smov [#allocation7]  }
   0xc   :  { %v41_v2 = vld [vmem:[#allocation2 + $0x8] sm:$0xff]  ;;  %v44_v3 = vperm.slane %v42_v1, 0  ;;  %v45_v4 = vperm.slane %v42_v1, 1  ;;  %s57_s19 = sshll.u32 %s153_s0, 4  ;;  %s59_s1 = sshll.u32 %s180_s2, 4  ;;  %s58_s19 = int_to_ptr.vmem [resolvable:$true] %s57_s19  ;;  %s60_s1 = int_to_ptr.hbm [resolvable:$true] %s59_s1 }
   0xe   :  { %v48_v5 = vadd.f32 %v44_v3, %v40_v0  ;;  %v49_v6 = vadd.f32 %v45_v4, %v41_v2 }
  0x10   :  { %50 = vst [vmem:[#allocation7] sm:$0xff] %v48_v5 }
  0x11   :  { %51 = vst [vmem:[#allocation7 + $0x8] sm:$0xff] %v49_v6 }
  0x12   :  { %62 = dma.vmem_to_hbm [thread:$0]  %s58_s19, 256, %s60_s1, [#allocation4]  }
  0x13   :  { %149 = dma.done.wait [#allocation4], 256  }
  0x14   :  { %150 = vsyncadd [#allocation4], 4294967040 }
  0x15   :  { %67 = vsyncpa [#allocation3], 1 }
  0x16   :  { %68 = vsyncpa [#allocation6], 1 }
  0x17   :  { %69 = vsyncpa [#allocation4], 1 }

</bundles_post_ra>
